<compile_context>
chip_gen: v5e
topology: v5e:2x2
jax: 0.10.0
libtpu: 0.0.40
codegen_flags: <defaults>
</compile_context>

<pallas_src>
import functools

import jax
import jax.numpy as jnp
from jax.experimental import pallas as pl
from jax.experimental.pallas import tpu as pltpu

_LANE = 128
_SUBLANE = 8


def _qnet_kernel(x_ref,
                 w1_ref,
                 w2_ref, b2_ref,
                 w3_ref, b3_ref,
                 w4_ref, b4_ref,
                 w5_ref, b5_ref,
                 o_ref):
    # Layer 1: bias already folded into w1 via the ones column appended to x.
    h = jnp.maximum(
        jnp.dot(x_ref[...], w1_ref[...], preferred_element_type=jnp.float32), 0.0)
    h = jnp.maximum(
        jnp.dot(h, w2_ref[...], preferred_element_type=jnp.float32) + b2_ref[...], 0.0)
    h = jnp.maximum(
        jnp.dot(h, w3_ref[...], preferred_element_type=jnp.float32) + b3_ref[...], 0.0)
    h = jnp.maximum(
        jnp.dot(h, w4_ref[...], preferred_element_type=jnp.float32) + b4_ref[...], 0.0)
    # Final layer: lane-dense (padded-to-128) output, plain f32 vst, no extra cast.
    o_ref[...] = jnp.dot(h, w5_ref[...], preferred_element_type=jnp.float32) + b5_ref[...]


def _round_up(n, m):
    return ((n + m - 1) // m) * m


def dqn_qnetwork_forward(x, params, tile_b=256):
    """x: (B, state_len) f32.  params: list of 5 (W, b) with W (in, out), b (1, out)."""
    (w1, b1), (w2, b2), (w3, b3), (w4, b4), (w5, b5) = params
    B, state_len = x.shape
    H = w1.shape[1]                      # hidden width (128)
    action_len = w5.shape[1]

    # --- First-layer K padding + bias folding (ones column in x, bias row in W1). ---
    K1 = _round_up(state_len + 1, _SUBLANE)
    x_pad = jnp.zeros((B, K1), x.dtype)
    x_pad = x_pad.at[:, :state_len].set(x).at[:, state_len].set(1.0)
    w1_pad = jnp.zeros((K1, H), w1.dtype)
    w1_pad = w1_pad.at[:state_len, :].set(w1).at[state_len, :].set(b1[0])

    # --- Lane-dense final layer: pad action_len -> multiple of 128 with zeros. ---
    N5 = _round_up(action_len, _LANE)
    w5_pad = jnp.zeros((H, N5), w5.dtype).at[:, :action_len].set(w5)
    b5_pad = jnp.zeros((1, N5), b5.dtype).at[:, :action_len].set(b5)

    # --- Batch tiling: biggest useful tile, batch padded to a tile multiple. ---
    if B >= tile_b:
        TILE_B = tile_b
    else:
        TILE_B = _round_up(max(B, 1), _SUBLANE)
    Bp = _round_up(B, TILE_B)
    if Bp != B:
        x_pad = jnp.pad(x_pad, ((0, Bp - B), (0, 0)))
    grid = (Bp // TILE_B,)

    batch_block = lambda i: (i, 0)       # x / out tiles walk the batch axis
    const_block = lambda i: (0, 0)       # weights & biases stay VMEM-resident

    out_padded = pl.pallas_call(
        _qnet_kernel,
        out_shape=jax.ShapeDtypeStruct((Bp, N5), jnp.float32),
        grid=grid,
        in_specs=[
            pl.BlockSpec((TILE_B, K1), batch_block),   # x (padded K, ones col)
            pl.BlockSpec((K1, H), const_block),        # w1 (bias folded)
            pl.BlockSpec((H, H), const_block),         # w2
            pl.BlockSpec((1, H), const_block),         # b2
            pl.BlockSpec((H, H), const_block),         # w3
            pl.BlockSpec((1, H), const_block),         # b3
            pl.BlockSpec((H, H), const_block),         # w4
            pl.BlockSpec((1, H), const_block),         # b4
            pl.BlockSpec((H, N5), const_block),        # w5 (lane-padded)
            pl.BlockSpec((1, N5), const_block),        # b5 (lane-padded)
        ],
        out_specs=pl.BlockSpec((TILE_B, N5), batch_block),
        compiler_params=pltpu.CompilerParams(
            dimension_semantics=("parallel",)),
    )(x_pad, w1_pad, w2, b2, w3, b3, w4, b4, w5_pad, b5_pad)

    return out_padded[:B, :action_len]


def init_params(key, state_len, action_len,
                layer1=128, layer2=128, layer3=128, layer4=128):
    """Deterministic init mimicking nn.Linear's U(-1/sqrt(fan_in), 1/sqrt(fan_in))."""
    dims = [state_len, layer1, layer2, layer3, layer4, action_len]
    params = []
    for i in range(5):
        fan_in, fan_out = dims[i], dims[i + 1]
        key, kw, kb = jax.random.split(key, 3)
        bound = 1.0 / jnp.sqrt(jnp.float32(fan_in))
        W = jax.random.uniform(kw, (fan_in, fan_out), jnp.float32, -bound, bound)
        b = jax.random.uniform(kb, (1, fan_out), jnp.float32, -bound, bound)
        params.append((W, b))
    return params


def reference_forward(x, params):
    h = x
    for i, (W, b) in enumerate(params):
        h = h @ W + b
        if i < len(params) - 1:
            h = jnp.maximum(h, 0.0)
    return h


if __name__ == "__main__":
    key = jax.random.PRNGKey(0)
    k_params, k_x1, k_x2 = jax.random.split(key, 3)

    state_len = 4     # e.g. RAN slice KPM state vector
    action_len = 3    # one Q-value per action
    params = init_params(k_params, state_len, action_len)

    fwd = jax.jit(functools.partial(dqn_qnetwork_forward, tile_b=128))

    # Small per-step inference batch (single grid step).
    x_small = jax.random.normal(k_x1, (8, state_len), dtype=jnp.float32)
    q_small = fwd(x_small, params)
    jax.block_until_ready(q_small)
    assert q_small.shape == (8, action_len)
    assert jnp.allclose(q_small, reference_forward(x_small, params),
                        atol=1e-4, rtol=1e-4), "small-batch mismatch vs reference"

    # Replay-buffer-sized batch exercising the batch grid + ragged tail padding.
    x_big = jax.random.normal(k_x2, (300, state_len), dtype=jnp.float32)
    q_big = fwd(x_big, params)
    jax.block_until_ready(q_big)
    assert q_big.shape == (300, action_len)
    assert jnp.allclose(q_big, reference_forward(x_big, params),
                        atol=1e-4, rtol=1e-4), "large-batch mismatch vs reference"

    print("KERNEL_OK")
</pallas_src>

<mosaic_0001>
module attributes {stable_mosaic.version = 11 : i64} {
  func.func @_qnet_kernel(%arg0: i32, %arg1: memref<8x8xf32, #tpu.memory_space<vmem>>, %arg2: memref<8x128xf32, #tpu.memory_space<vmem>>, %arg3: memref<128x128xf32, #tpu.memory_space<vmem>>, %arg4: memref<1x128xf32, #tpu.memory_space<vmem>>, %arg5: memref<128x128xf32, #tpu.memory_space<vmem>>, %arg6: memref<1x128xf32, #tpu.memory_space<vmem>>, %arg7: memref<128x128xf32, #tpu.memory_space<vmem>>, %arg8: memref<1x128xf32, #tpu.memory_space<vmem>>, %arg9: memref<128x128xf32, #tpu.memory_space<vmem>>, %arg10: memref<1x128xf32, #tpu.memory_space<vmem>>, %arg11: memref<8x128xf32, #tpu.memory_space<vmem>>) attributes {dimension_semantics = [#tpu.dimension_semantics<parallel>], iteration_bounds = array<i64: 1>, scalar_prefetch = 0 : i64, scratch_operands = 0 : i64, tpu.core_type = #tpu.core_type<tc>, window_params = [{transform_indices = @transform_0, window_bounds = array<i64: 8, 8>}, {pipeline_mode = #tpu.pipeline_mode<synchronous>, transform_indices = @transform_1, window_bounds = array<i64: 8, 128>}, {pipeline_mode = #tpu.pipeline_mode<synchronous>, transform_indices = @transform_2, window_bounds = array<i64: 128, 128>}, {pipeline_mode = #tpu.pipeline_mode<synchronous>, transform_indices = @transform_3, window_bounds = array<i64: 1, 128>}, {pipeline_mode = #tpu.pipeline_mode<synchronous>, transform_indices = @transform_4, window_bounds = array<i64: 128, 128>}, {pipeline_mode = #tpu.pipeline_mode<synchronous>, transform_indices = @transform_5, window_bounds = array<i64: 1, 128>}, {pipeline_mode = #tpu.pipeline_mode<synchronous>, transform_indices = @transform_6, window_bounds = array<i64: 128, 128>}, {pipeline_mode = #tpu.pipeline_mode<synchronous>, transform_indices = @transform_7, window_bounds = array<i64: 1, 128>}, {pipeline_mode = #tpu.pipeline_mode<synchronous>, transform_indices = @transform_8, window_bounds = array<i64: 128, 128>}, {pipeline_mode = #tpu.pipeline_mode<synchronous>, transform_indices = @transform_9, window_bounds = array<i64: 1, 128>}, {transform_indices = @transform_10, window_bounds = array<i64: 8, 128>}]} {
    %c0 = arith.constant 0 : index
    %c0_0 = arith.constant 0 : index
    %0 = vector.load %arg1[%c0, %c0_0] : memref<8x8xf32, #tpu.memory_space<vmem>>, vector<8x8xf32>
    %c0_1 = arith.constant 0 : index
    %c0_2 = arith.constant 0 : index
    %1 = vector.load %arg2[%c0_1, %c0_2] : memref<8x128xf32, #tpu.memory_space<vmem>>, vector<8x128xf32>
    %cst = arith.constant dense<0.000000e+00> : vector<8x128xf32>
    %2 = tpu.matmul %0, %1, %cst {dimension_numbers = #tpu.dot_dimension_numbers<[1], [0], [0], [1], [0, 0, 1, 1], [], []>} : vector<8x8xf32>, vector<8x128xf32>, vector<8x128xf32> -> vector<8x128xf32>
    %cst_3 = arith.constant 0.000000e+00 : f32
    %3 = vector.broadcast %cst_3 : f32 to vector<8x128xf32>
    %4 = arith.maximumf %2, %3 : vector<8x128xf32>
    %c0_4 = arith.constant 0 : index
    %c0_5 = arith.constant 0 : index
    %5 = vector.load %arg3[%c0_4, %c0_5] : memref<128x128xf32, #tpu.memory_space<vmem>>, vector<128x128xf32>
    %cst_6 = arith.constant dense<0.000000e+00> : vector<8x128xf32>
    %6 = tpu.matmul %4, %5, %cst_6 {dimension_numbers = #tpu.dot_dimension_numbers<[1], [0], [0], [1], [0, 0, 1, 1], [], []>} : vector<8x128xf32>, vector<128x128xf32>, vector<8x128xf32> -> vector<8x128xf32>
    %c0_7 = arith.constant 0 : index
    %c0_8 = arith.constant 0 : index
    %7 = vector.load %arg4[%c0_7, %c0_8] : memref<1x128xf32, #tpu.memory_space<vmem>>, vector<1x128xf32>
    %8 = vector.broadcast %7 : vector<1x128xf32> to vector<8x128xf32>
    %9 = arith.addf %6, %8 : vector<8x128xf32>
    %cst_9 = arith.constant 0.000000e+00 : f32
    %10 = vector.broadcast %cst_9 : f32 to vector<8x128xf32>
    %11 = arith.maximumf %9, %10 : vector<8x128xf32>
    %c0_10 = arith.constant 0 : index
    %c0_11 = arith.constant 0 : index
    %12 = vector.load %arg5[%c0_10, %c0_11] : memref<128x128xf32, #tpu.memory_space<vmem>>, vector<128x128xf32>
    %cst_12 = arith.constant dense<0.000000e+00> : vector<8x128xf32>
    %13 = tpu.matmul %11, %12, %cst_12 {dimension_numbers = #tpu.dot_dimension_numbers<[1], [0], [0], [1], [0, 0, 1, 1], [], []>} : vector<8x128xf32>, vector<128x128xf32>, vector<8x128xf32> -> vector<8x128xf32>
    %c0_13 = arith.constant 0 : index
    %c0_14 = arith.constant 0 : index
    %14 = vector.load %arg6[%c0_13, %c0_14] : memref<1x128xf32, #tpu.memory_space<vmem>>, vector<1x128xf32>
    %15 = vector.broadcast %14 : vector<1x128xf32> to vector<8x128xf32>
    %16 = arith.addf %13, %15 : vector<8x128xf32>
    %cst_15 = arith.constant 0.000000e+00 : f32
    %17 = vector.broadcast %cst_15 : f32 to vector<8x128xf32>
    %18 = arith.maximumf %16, %17 : vector<8x128xf32>
    %c0_16 = arith.constant 0 : index
    %c0_17 = arith.constant 0 : index
    %19 = vector.load %arg7[%c0_16, %c0_17] : memref<128x128xf32, #tpu.memory_space<vmem>>, vector<128x128xf32>
    %cst_18 = arith.constant dense<0.000000e+00> : vector<8x128xf32>
    %20 = tpu.matmul %18, %19, %cst_18 {dimension_numbers = #tpu.dot_dimension_numbers<[1], [0], [0], [1], [0, 0, 1, 1], [], []>} : vector<8x128xf32>, vector<128x128xf32>, vector<8x128xf32> -> vector<8x128xf32>
    %c0_19 = arith.constant 0 : index
    %c0_20 = arith.constant 0 : index
    %21 = vector.load %arg8[%c0_19, %c0_20] : memref<1x128xf32, #tpu.memory_space<vmem>>, vector<1x128xf32>
    %22 = vector.broadcast %21 : vector<1x128xf32> to vector<8x128xf32>
    %23 = arith.addf %20, %22 : vector<8x128xf32>
    %cst_21 = arith.constant 0.000000e+00 : f32
    %24 = vector.broadcast %cst_21 : f32 to vector<8x128xf32>
    %25 = arith.maximumf %23, %24 : vector<8x128xf32>
    %c0_22 = arith.constant 0 : index
    %c0_23 = arith.constant 0 : index
    %26 = vector.load %arg9[%c0_22, %c0_23] : memref<128x128xf32, #tpu.memory_space<vmem>>, vector<128x128xf32>
    %cst_24 = arith.constant dense<0.000000e+00> : vector<8x128xf32>
    %27 = tpu.matmul %25, %26, %cst_24 {dimension_numbers = #tpu.dot_dimension_numbers<[1], [0], [0], [1], [0, 0, 1, 1], [], []>} : vector<8x128xf32>, vector<128x128xf32>, vector<8x128xf32> -> vector<8x128xf32>
    %c0_25 = arith.constant 0 : index
    %c0_26 = arith.constant 0 : index
    %28 = vector.load %arg10[%c0_25, %c0_26] : memref<1x128xf32, #tpu.memory_space<vmem>>, vector<1x128xf32>
    %29 = vector.broadcast %28 : vector<1x128xf32> to vector<8x128xf32>
    %30 = arith.addf %27, %29 : vector<8x128xf32>
    %c0_27 = arith.constant 0 : index
    %c0_28 = arith.constant 0 : index
    %31 = vector.load %arg11[%c0_27, %c0_28] : memref<8x128xf32, #tpu.memory_space<vmem>>, vector<8x128xf32>
    tpu.vector_store %arg11[%c0_27, %c0_28], %30 {strides = array<i32>} : memref<8x128xf32, #tpu.memory_space<vmem>>, vector<8x128xf32>,
    return
  }
  func.func @transform_0(%arg0: i32) -> (i32, i32) {
    %c0_i32 = arith.constant 0 : i32
    %c0_i32_0 = arith.constant 0 : i32
    return %arg0, %c0_i32 : i32, i32
  }
  func.func @transform_1(%arg0: i32) -> (i32, i32) {
    %c0_i32 = arith.constant 0 : i32
    %c0_i32_0 = arith.constant 0 : i32
    %c0_i32_1 = arith.constant 0 : i32
    return %c0_i32, %c0_i32_0 : i32, i32
  }
  func.func @transform_2(%arg0: i32) -> (i32, i32) {
    %c0_i32 = arith.constant 0 : i32
    %c0_i32_0 = arith.constant 0 : i32
    %c0_i32_1 = arith.constant 0 : i32
    return %c0_i32, %c0_i32_0 : i32, i32
  }
  func.func @transform_3(%arg0: i32) -> (i32, i32) {
    %c0_i32 = arith.constant 0 : i32
    %c0_i32_0 = arith.constant 0 : i32
    %c0_i32_1 = arith.constant 0 : i32
    return %c0_i32, %c0_i32_0 : i32, i32
  }
  func.func @transform_4(%arg0: i32) -> (i32, i32) {
    %c0_i32 = arith.constant 0 : i32
    %c0_i32_0 = arith.constant 0 : i32
    %c0_i32_1 = arith.constant 0 : i32
    return %c0_i32, %c0_i32_0 : i32, i32
  }
  func.func @transform_5(%arg0: i32) -> (i32, i32) {
    %c0_i32 = arith.constant 0 : i32
    %c0_i32_0 = arith.constant 0 : i32
    %c0_i32_1 = arith.constant 0 : i32
    return %c0_i32, %c0_i32_0 : i32, i32
  }
  func.func @transform_6(%arg0: i32) -> (i32, i32) {
    %c0_i32 = arith.constant 0 : i32
    %c0_i32_0 = arith.constant 0 : i32
    %c0_i32_1 = arith.constant 0 : i32
    return %c0_i32, %c0_i32_0 : i32, i32
  }
  func.func @transform_7(%arg0: i32) -> (i32, i32) {
    %c0_i32 = arith.constant 0 : i32
    %c0_i32_0 = arith.constant 0 : i32
    %c0_i32_1 = arith.constant 0 : i32
    return %c0_i32, %c0_i32_0 : i32, i32
  }
  func.func @transform_8(%arg0: i32) -> (i32, i32) {
    %c0_i32 = arith.constant 0 : i32
    %c0_i32_0 = arith.constant 0 : i32
    %c0_i32_1 = arith.constant 0 : i32
    return %c0_i32, %c0_i32_0 : i32, i32
  }
  func.func @transform_9(%arg0: i32) -> (i32, i32) {
    %c0_i32 = arith.constant 0 : i32
    %c0_i32_0 = arith.constant 0 : i32
    %c0_i32_1 = arith.constant 0 : i32
    return %c0_i32, %c0_i32_0 : i32, i32
  }
  func.func @transform_10(%arg0: i32) -> (i32, i32) {
    %c0_i32 = arith.constant 0 : i32
    %c0_i32_0 = arith.constant 0 : i32
    return %arg0, %c0_i32 : i32, i32
  }
}

</mosaic_0001>

<bundles_post_ra>
// kernel: dqn_qnetwork_forward.1
= control target key start
LH: loop header
LB: loop body
LE: loop exit
PB: predicated region body
PF: predicated region fallthrough
CT: control target
= control target key end

     0   :  { %vm37_vm0 = vcmask 64512   ;;  %s503_s1 = inlined_call_operand.vmem [shape: f32[8,128], index: 1, kind: input, shape index: {}]   ;;  %s504_s0 = inlined_call_operand.vmem [shape: f32[8,8], index: 0, kind: input, shape index: {}]   ;;  %s505_s2 = inlined_call_operand.vmem [shape: f32[128,128], index: 2, kind: input, shape index: {}]   ;;  %s506_s3 = inlined_call_operand.vmem [shape: f32[1,128], index: 3, kind: input, shape index: {}]   ;;  %s507_s4 = inlined_call_operand.vmem [shape: f32[128,128], index: 4, kind: input, shape index: {}]   ;;  %s508_s5 = inlined_call_operand.vmem [shape: f32[1,128], index: 5, kind: input, shape index: {}]   ;;  %s509_s6 = inlined_call_operand.vmem [shape: f32[128,128], index: 6, kind: input, shape index: {}]   ;;  %s510_s7 = inlined_call_operand.vmem [shape: f32[1,128], index: 7, kind: input, shape index: {}]   ;;  %s511_s8 = inlined_call_operand.vmem [shape: f32[128,128], index: 8, kind: input, shape index: {}]   ;;  %s512_s9 = inlined_call_operand.vmem [shape: f32[1,128], index: 9, kind: input, shape index: {}]   ;;  %s513_s10 = inlined_call_operand.vmem [shape: f32[8,128], index: 10, kind: output, shape index: {}]  }
   0x1   :  { %v36_v0 = vld [vmem:[%s503_s1] sm:$0xff]  ;;  %v77_v2 = vld [vmem:[%s505_s2 + $0x78] sm:$0xff]  ;;  %v76_v3 = vld [vmem:[%s505_s2 + $0x70] sm:$0xff] }
   0x2   :  { %v35_v1 = vld [vmem:[%s504_s0] sm:$0xff]  ;;  %56 = vmatpush.msra.mxu0 %v36_v0  ;;  %82 = vmatpush.msra.mxu1 %v77_v2  ;;  %v75_v4 = vld [vmem:[%s505_s2 + $0x68] sm:$0xff]  ;;  %v73_v6 = vld [vmem:[%s505_s2 + $0x58] sm:$0xff] }
   0x3   :  { %230 = vmatmul.msk.f32.vlgmr.msra.gmra.mxu0 %vm37_vm0, %v35_v1  ;;  %v74_v5 = vld [vmem:[%s505_s2 + $0x60] sm:$0xff]  ;;  %v72_v7 = vld [vmem:[%s505_s2 + $0x50] sm:$0xff]  ;;  %v71_v8 = vld [vmem:[%s505_s2 + $0x48] sm:$0xff] }
   0x4   :  { %83 = vmatpush.msra.mxu1 %v76_v3  ;;  %v70_v9 = vld [vmem:[%s505_s2 + $0x40] sm:$0xff]  ;;  %v69_v10 = vld [vmem:[%s505_s2 + $0x38] sm:$0xff]  ;;  %v68_v11 = vld [vmem:[%s505_s2 + $0x30] sm:$0xff] }
   0x5   :  { %v67_v12 = vld [vmem:[%s505_s2 + $0x28] sm:$0xff]  ;;  %v66_v13 = vld [vmem:[%s505_s2 + $0x20] sm:$0xff]  ;;  %v65_v14 = vld [vmem:[%s505_s2 + $0x18] sm:$0xff] }
   0x6   :  { %84 = vmatpush.msra.mxu1 %v75_v4  ;;  %v64_v15 = vld [vmem:[%s505_s2 + $0x10] sm:$0xff]  ;;  %v63_v16 = vld [vmem:[%s505_s2 + $0x8] sm:$0xff]  ;;  %v62_v17 = vld [vmem:[%s505_s2] sm:$0xff] }
   0x7   :  { %v118_v18 = vld [vmem:[%s507_s4 + $0x78] sm:$0xff]  ;;  %v117_v19 = vld [vmem:[%s507_s4 + $0x70] sm:$0xff]  ;;  %v116_v20 = vld [vmem:[%s507_s4 + $0x68] sm:$0xff] }
   0x8   :  { %85 = vmatpush.msra.mxu1 %v74_v5  ;;  %123 = vmatpush.msra.mxu2 %v118_v18  ;;  %v115_v21 = vld [vmem:[%s507_s4 + $0x60] sm:$0xff]  ;;  %v114_v22 = vld [vmem:[%s507_s4 + $0x58] sm:$0xff]  ;;  %v113_v23 = vld [vmem:[%s507_s4 + $0x50] sm:$0xff] }
   0x9   :  { %v112_v24 = vld [vmem:[%s507_s4 + $0x48] sm:$0xff]  ;;  %v111_v25 = vld [vmem:[%s507_s4 + $0x40] sm:$0xff]  ;;  %v110_v26 = vld [vmem:[%s507_s4 + $0x38] sm:$0xff] }
   0xa   :  { %86 = vmatpush.msra.mxu1 %v73_v6  ;;  %124 = vmatpush.msra.mxu2 %v117_v19  ;;  %v109_v27 = vld [vmem:[%s507_s4 + $0x30] sm:$0xff]  ;;  %v108_v28 = vld [vmem:[%s507_s4 + $0x28] sm:$0xff]  ;;  %v107_v29 = vld [vmem:[%s507_s4 + $0x20] sm:$0xff] }
   0xb   :  { %v106_v30 = vld [vmem:[%s507_s4 + $0x18] sm:$0xff]  ;;  %v105_v33 = vld [vmem:[%s507_s4 + $0x10] sm:$0xff]  ;;  %v104_v34 = vld [vmem:[%s507_s4 + $0x8] sm:$0xff] }
   0xc   :  { %87 = vmatpush.msra.mxu1 %v72_v7  ;;  %125 = vmatpush.msra.mxu2 %v116_v20  ;;  %v103_v35 = vld [vmem:[%s507_s4] sm:$0xff]  ;;  %v159_v36 = vld [vmem:[%s509_s6 + $0x78] sm:$0xff]  ;;  %v158_v37 = vld [vmem:[%s509_s6 + $0x70] sm:$0xff] }
   0xd   :  { %164 = vmatpush.msra.mxu3 %v159_v36  ;;  %v157_v38 = vld [vmem:[%s509_s6 + $0x68] sm:$0xff]  ;;  %v156_v39 = vld [vmem:[%s509_s6 + $0x60] sm:$0xff]  ;;  %v155_v40 = vld [vmem:[%s509_s6 + $0x58] sm:$0xff] }
   0xe   :  { %88 = vmatpush.msra.mxu1 %v71_v8  ;;  %126 = vmatpush.msra.mxu2 %v115_v21  ;;  %v154_v41 = vld [vmem:[%s509_s6 + $0x50] sm:$0xff]  ;;  %v153_v42 = vld [vmem:[%s509_s6 + $0x48] sm:$0xff]  ;;  %v152_v43 = vld [vmem:[%s509_s6 + $0x40] sm:$0xff] }
   0xf   :  { %165 = vmatpush.msra.mxu3 %v158_v37  ;;  %v151_v44 = vld [vmem:[%s509_s6 + $0x38] sm:$0xff]  ;;  %v150_v45 = vld [vmem:[%s509_s6 + $0x30] sm:$0xff]  ;;  %v149_v46 = vld [vmem:[%s509_s6 + $0x28] sm:$0xff] }
  0x10   :  { %89 = vmatpush.msra.mxu1 %v70_v9  ;;  %127 = vmatpush.msra.mxu2 %v114_v22  ;;  %v148_v47 = vld [vmem:[%s509_s6 + $0x20] sm:$0xff]  ;;  %v147_v48 = vld [vmem:[%s509_s6 + $0x18] sm:$0xff]  ;;  %v146_v53 = vld [vmem:[%s509_s6 + $0x10] sm:$0xff] }
  0x11   :  { %166 = vmatpush.msra.mxu3 %v157_v38  ;;  %v231_v49 = vld [vmem:[%s506_s3] ss:$0 sm:$0xff]  ;;  %v145_v54 = vld [vmem:[%s509_s6 + $0x8] sm:$0xff]  ;;  %v200_v56 = vld [vmem:[%s511_s8 + $0x78] sm:$0xff] }
  0x12   :  { %90 = vmatpush.msra.mxu1 %v69_v10  ;;  %128 = vmatpush.msra.mxu2 %v113_v23  ;;  %v144_v55 = vld [vmem:[%s509_s6] sm:$0xff]  ;;  %v199_v57 = vld [vmem:[%s511_s8 + $0x70] sm:$0xff]  ;;  %v198_v58 = vld [vmem:[%s511_s8 + $0x68] sm:$0xff] }
  0x13   :  { %167 = vmatpush.msra.mxu3 %v156_v39  ;;  %205 = vmatpush.msrb.mxu0 %v200_v56  ;;  %v197_v59 = vld [vmem:[%s511_s8 + $0x60] sm:$0xff]  ;;  %v196_v60 = vld [vmem:[%s511_s8 + $0x58] sm:$0xff]  ;;  %v195_v61 = vld [vmem:[%s511_s8 + $0x50] sm:$0xff] }
  0x14   :  { %91 = vmatpush.msra.mxu1 %v68_v11  ;;  %129 = vmatpush.msra.mxu2 %v112_v24  ;;  %v194_v62 = vld [vmem:[%s511_s8 + $0x48] sm:$0xff]  ;;  %v193_v63 = vld [vmem:[%s511_s8 + $0x40] sm:$0xff]  ;;  %v192_v0 = vld [vmem:[%s511_s8 + $0x38] sm:$0xff] }
  0x15   :  { %168 = vmatpush.msra.mxu3 %v155_v40  ;;  %206 = vmatpush.msrb.mxu0 %v199_v57  ;;  %v191_v1 = vld [vmem:[%s511_s8 + $0x30] sm:$0xff]  ;;  %v190_v2 = vld [vmem:[%s511_s8 + $0x28] sm:$0xff]  ;;  %v189_v3 = vld [vmem:[%s511_s8 + $0x20] sm:$0xff] }
  0x16   :  { %92 = vmatpush.msra.mxu1 %v67_v12  ;;  %130 = vmatpush.msra.mxu2 %v111_v25  ;;  %v188_v4 = vld [vmem:[%s511_s8 + $0x18] sm:$0xff]  ;;  %v232_v5 = vld [vmem:[%s508_s5] ss:$0 sm:$0xff]  ;;  %v187_v9 = vld [vmem:[%s511_s8 + $0x10] sm:$0xff] }
  0x17   :  { %169 = vmatpush.msra.mxu3 %v154_v41  ;;  %207 = vmatpush.msrb.mxu0 %v198_v58  ;;  %v186_v10 = vld [vmem:[%s511_s8 + $0x8] sm:$0xff]  ;;  %v185_v11 = vld [vmem:[%s511_s8] sm:$0xff] }
  0x18   :  { %93 = vmatpush.msra.mxu1 %v66_v13  ;;  %131 = vmatpush.msra.mxu2 %v110_v26  ;;  %v233_v12 = vld [vmem:[%s510_s7] ss:$0 sm:$0xff] }
  0x19   :  { %170 = vmatpush.msra.mxu3 %v153_v42  ;;  %208 = vmatpush.msrb.mxu0 %v197_v59 }
  0x1a   :  { %94 = vmatpush.msra.mxu1 %v65_v14  ;;  %132 = vmatpush.msra.mxu2 %v109_v27 }
  0x1b   :  { %171 = vmatpush.msra.mxu3 %v152_v43  ;;  %209 = vmatpush.msrb.mxu0 %v196_v60 }
  0x1c   :  { %95 = vmatpush.msra.mxu1 %v64_v15  ;;  %133 = vmatpush.msra.mxu2 %v108_v28 }
  0x1d   :  { %172 = vmatpush.msra.mxu3 %v151_v44  ;;  %210 = vmatpush.msrb.mxu0 %v195_v61 }
  0x1e   :  { %96 = vmatpush.msra.mxu1 %v63_v16  ;;  %134 = vmatpush.msra.mxu2 %v107_v29  ;;  %v234_v16 = vld [vmem:[%s512_s9] ss:$0 sm:$0xff] }
  0x1f   :  { %173 = vmatpush.msra.mxu3 %v150_v45  ;;  %211 = vmatpush.msrb.mxu0 %v194_v62 }
  0x20   :  { %97 = vmatpush.msra.mxu1 %v62_v17  ;;  %135 = vmatpush.msra.mxu2 %v106_v30 }
  0x21   :  { %174 = vmatpush.msra.mxu3 %v149_v46  ;;  %212 = vmatpush.msrb.mxu0 %v193_v63 }
  0x22   :  { %136 = vmatpush.msra.mxu2 %v105_v33 }
  0x23   :  { %175 = vmatpush.msra.mxu3 %v148_v47  ;;  %213 = vmatpush.msrb.mxu0 %v192_v0 }
  0x24   :  { %137 = vmatpush.msra.mxu2 %v104_v34 }
  0x25   :  { %176 = vmatpush.msra.mxu3 %v147_v48  ;;  %214 = vmatpush.msrb.mxu0 %v191_v1 }
  0x26   :  { %138 = vmatpush.msra.mxu2 %v103_v35 }
  0x27   :  { %177 = vmatpush.msra.mxu3 %v146_v53  ;;  %215 = vmatpush.msrb.mxu0 %v190_v2 }
  0x29   :  { %178 = vmatpush.msra.mxu3 %v145_v54  ;;  %216 = vmatpush.msrb.mxu0 %v189_v3 }
  0x2b   :  { %179 = vmatpush.msra.mxu3 %v144_v55  ;;  %217 = vmatpush.msrb.mxu0 %v188_v4 }
  0x2d   :  { %218 = vmatpush.msrb.mxu0 %v187_v9 }
  0x2f   :  { %219 = vmatpush.msrb.mxu0 %v186_v10 }
  0x31   :  { %220 = vmatpush.msrb.mxu0 %v185_v11 }
  0x80   :  { %v58_v31 = vpop.f32.mrf.mxu0 }
  0x81   :  { %v61_v32 = vmax.f32 %v58_v31, 0.0 }
  0x83   :  { %98 = vmatmul.f32.vlgmr.msra.gmra.mxu1 %v61_v32 }
 0x100   :  { %v99_v50 = vpop.f32.mrf.mxu1 }
 0x101   :  { %v100_v51 = vadd.f32 %v231_v49, %v99_v50 }
 0x103   :  { %v102_v52 = vmax.f32 %v100_v51, 0.0 }
 0x105   :  { %139 = vmatmul.f32.vlgmr.msra.gmra.mxu2 %v102_v52 }
 0x188   :  { %v140_v6 = vpop.f32.mrf.mxu2 }
 0x189   :  { %v141_v7 = vadd.f32 %v232_v5, %v140_v6 }
 0x18b   :  { %v143_v8 = vmax.f32 %v141_v7, 0.0 }
 0x18d   :  { %180 = vmatmul.f32.vlgmr.msra.gmra.mxu3 %v143_v8 }
 0x210   :  { %v181_v13 = vpop.f32.mrf.mxu3 }
 0x211   :  { %v182_v14 = vadd.f32 %v233_v12, %v181_v13 }
 0x213   :  { %v184_v15 = vmax.f32 %v182_v14, 0.0 }
 0x215   :  { %221 = vmatmul.f32.vlgmr.msrb.gmra.mxu0 %v184_v15 }
 0x292   :  { %v222_v17 = vpop.f32.mrf.mxu0 }
 0x293   :  { %v223_v18 = vadd.f32 %v234_v16, %v222_v17 }
 0x295   :  { %225 = vst [vmem:[%s513_s10] sm:$0xff] %v223_v18 }

</bundles_post_ra>
